<compile_context>
chip_gen: v7x
topology: tpu7x:2x2x1
jax: 0.10.0
libtpu: 0.0.40
codegen_flags: <defaults>
</compile_context>

<pallas_src>
import functools

import jax
import jax.numpy as jnp
from jax import lax
from jax.experimental import pallas as pl
from jax.experimental.pallas import tpu as pltpu

BN_EPS = 1e-4


def _round_up(v, m):
    return ((v + m - 1) // m) * m


# --------------------------------------------------------------------------------
# Pass 1: accumulate per-batch graph-projection / Gram / sum statistics (both halves)
# --------------------------------------------------------------------------------
def _stats_kernel(x_ref, w_aug_ref, b_aug_ref,
                  cross_ref, g0_ref, g1_ref,
                  *, C, K, l_valid, lt_size, needs_mask):
    f32 = jnp.float32
    lt = pl.program_id(1)

    @pl.when(lt == 0)
    def _init():
        cross_ref[...] = jnp.zeros_like(cross_ref)
        g0_ref[...] = jnp.zeros_like(g0_ref)
        g1_ref[...] = jnp.zeros_like(g1_ref)

    xt = x_ref[0]                              # (2C, LT) -- single read of both halves
    w = w_aug_ref[...]                         # (K+S+1, C)
    b = b_aug_ref[...]                         # (K+S+1, 1)

    # Z row layout: [x_proj (K rows) ; x_state (S rows) ; ones (1 row)]
    # Z1 comes from x1: proj used by half 1, state of half 0 (and vice versa for Z2).
    z1 = jnp.dot(w, xt[:C, :], preferred_element_type=f32) + b
    z2 = jnp.dot(w, xt[C:, :], preferred_element_type=f32) + b

    if needs_mask:
        lane = lax.broadcasted_iota(jnp.int32, (1, lt_size), 1) + lt * lt_size
        valid = lane < l_valid
        z1 = jnp.where(valid, z1, 0.0)
        z2 = jnp.where(valid, z2, 0.0)

    # Merged Gram-style product: a0, a1^T, s0, s1 all fall out of Z1 @ Z2^T.
    cross_ref[0] += jnp.einsum('il,jl->ij', z1, z2, preferred_element_type=f32)

    xp1 = z1[:K, :]                            # projection consumed by half 1
    xp0 = z2[:K, :]                            # projection consumed by half 0
    g0_ref[0] += jnp.einsum('kl,jl->kj', xp0, xp0, preferred_element_type=f32)
    g1_ref[0] += jnp.einsum('kl,jl->kj', xp1, xp1, preferred_element_type=f32)


# --------------------------------------------------------------------------------
# Pass 2: out = x + M2[nb] @ (W2 @ x) + shift2[nb]   (both halves in one tile)
# --------------------------------------------------------------------------------
def _apply_kernel(x_ref, w2_ref, m2_ref, sh_ref, out_ref):
    f32 = jnp.float32
    xt = x_ref[0]                                                  # (2C, LT)
    xp = jnp.dot(w2_ref[...], xt, preferred_element_type=f32)     # (2K, LT) = [xp0; xp1]
    y = jnp.dot(m2_ref[0], xp, preferred_element_type=f32)        # (2C, LT)
    out_ref[0] = xt + y + sh_ref[0]


@functools.partial(jax.jit, static_argnames=("lane_tile",))
def glore_unit(x, params, *, lane_tile=1024):
    """x: (n, 2*num_in, D, H, W) float32. Returns same shape."""
    n, c2, d, hgt, w = x.shape
    c = c2 // 2
    assert 2 * c == c2
    assert c % 8 == 0, "channels per half must be a multiple of 8 (TPU sublane tiling)"
    L = d * hgt * w
    S = params['w_state'].shape[0]
    K = params['w_proj'].shape[0]
    SKP = K + S + 1

    xf = x.reshape(n, c2, L).astype(jnp.float32)

    # Lane tile: multiple of 128 (lane-dense, unmasked stores).
    lt_size = min(_round_up(lane_tile, 128), _round_up(L, 128))
    l_pad = _round_up(L, lt_size)
    if l_pad != L:
        xf = jnp.pad(xf, ((0, 0), (0, 0), (0, l_pad - L)))
    n_lt = l_pad // lt_size
    needs_mask = (l_pad != L)

    # Right-size the VMEM request (double-buffered in+out tiles + headroom), <= 64 MiB.
    tile_bytes = c2 * lt_size * 4
    vmem_limit = int(min(max(4 * tile_bytes + (8 << 20), 16 << 20), 64 << 20))

    # Augmented channel-matmul weights: one matmul yields x_proj, x_state and a ones row.
    w_aug = jnp.concatenate(
        [params['w_proj'], params['w_state'], jnp.zeros((1, c), jnp.float32)], axis=0)
    b_aug = jnp.concatenate(
        [params['b_proj'], params['b_state'], jnp.ones((1, 1), jnp.float32)], axis=0)

    # ---------------------- pass 1: streaming statistics --------------------------
    cross, g0, g1 = pl.pallas_call(
        functools.partial(_stats_kernel, C=c, K=K, l_valid=L,
                          lt_size=lt_size, needs_mask=needs_mask),
        out_shape=(jax.ShapeDtypeStruct((n, SKP, SKP), jnp.float32),
                   jax.ShapeDtypeStruct((n, K, K), jnp.float32),
                   jax.ShapeDtypeStruct((n, K, K), jnp.float32)),
        grid_spec=pltpu.PrefetchScalarGridSpec(
            num_scalar_prefetch=0,
            grid=(n, n_lt),                                   # (batch, L-tile)
            in_specs=[
                pl.BlockSpec((1, c2, lt_size), lambda nb, lt: (nb, 0, lt)),
                pl.BlockSpec((SKP, c), lambda nb, lt: (0, 0)),
                pl.BlockSpec((SKP, 1), lambda nb, lt: (0, 0)),
            ],
            out_specs=(
                pl.BlockSpec((1, SKP, SKP), lambda nb, lt: (nb, 0, 0)),
                pl.BlockSpec((1, K, K), lambda nb, lt: (nb, 0, 0)),
                pl.BlockSpec((1, K, K), lambda nb, lt: (nb, 0, 0)),
            )),
        compiler_params=pltpu.CompilerParams(
            dimension_semantics=("parallel", "arbitrary"),
            vmem_limit_bytes=vmem_limit),
    )(xf, w_aug, b_aug)

    # ---------------------- tiny finalize (plain f32 XLA glue) --------------------
    hi = lax.Precision.HIGHEST
    # cross[n, i, j] = sum_l Z1[i, l] * Z2[j, l];  Z rows = [xp (K); xs (S); ones]
    a0 = cross[:, K:K + S, :K]                                   # xs0 . xp0^T  (n,S,K)
    a1 = jnp.swapaxes(cross[:, :K, K:K + S], 1, 2)               # xs1 . xp1^T  (n,S,K)
    s0 = cross[:, K + S, :K][:, :, None]                         # sum_L xp0    (n,K,1)
    s1 = cross[:, :K, K + S][:, :, None]                         # sum_L xp1    (n,K,1)
    inv_count = 1.0 / float(n * L)

    def half_coeffs(a, G, s, w1, b1, w2):
        # GCN (tiny, once per call)
        h = jnp.einsum('nsj,ij->nsi', a, w1, precision=hi) + b1[None] + a
        h = jnp.maximum(h, 0.0)
        rel = jnp.einsum('st,ntk->nsk', w2, h, precision=hi)          # (n,S,K)
        m = jnp.einsum('cs,nsk->nck', params['w_ext'], rel, precision=hi)   # (n,C,K)
        # Analytic training-mode BatchNorm statistics of y = m @ x_proj over (n, L).
        sum_y = jnp.sum(jnp.einsum('nck,nkz->ncz', m, s, precision=hi), axis=0)   # (C,1)
        mg = jnp.einsum('nck,nkj->ncj', m, G, precision=hi)
        sum_y2 = jnp.sum(jnp.sum(mg * m, axis=2, keepdims=True), axis=0)          # (C,1)
        mean = sum_y * inv_count
        var = jnp.maximum(sum_y2 * inv_count - mean * mean, 0.0)     # clamp (review)
        scale = params['bn_gamma'] * lax.rsqrt(var + BN_EPS)                       # (C,1)
        shift = params['bn_beta'] - scale * mean                                   # (C,1)
        ms = m * scale[None]                                         # fold BN scale into M
        # fold M @ b_proj + BN shift into a per-channel shift (drops bias add in pass 2)
        sh = jnp.einsum('nck,kz->ncz', ms, params['b_proj'], precision=hi) + shift[None]
        return ms, sh

    ms0, sh0 = half_coeffs(a0, g0, s0,
                           params['gcn_w1'][0], params['gcn_b1'][0], params['gcn_w2'][0])
    ms1, sh1 = half_coeffs(a1, g1, s1,
                           params['gcn_w1'][1], params['gcn_b1'][1], params['gcn_w2'][1])

    zC = jnp.zeros((n, c, K), jnp.float32)
    m2 = jnp.concatenate([jnp.concatenate([ms0, zC], axis=2),
                          jnp.concatenate([zC, ms1], axis=2)], axis=1)   # (n, 2C, 2K)
    sh2 = jnp.concatenate([sh0, sh1], axis=1)                            # (n, 2C, 1)
    zK = jnp.zeros((K, c), jnp.float32)
    w2full = jnp.concatenate([jnp.concatenate([zK, params['w_proj']], axis=1),
                              jnp.concatenate([params['w_proj'], zK], axis=1)],
                             axis=0)                                     # (2K, 2C)

    # ---------------------- pass 2: streaming apply --------------------------------
    out = pl.pallas_call(
        _apply_kernel,
        out_shape=jax.ShapeDtypeStruct((n, c2, l_pad), jnp.float32),
        grid_spec=pltpu.PrefetchScalarGridSpec(
            num_scalar_prefetch=0,
            grid=(n, n_lt),
            in_specs=[
                pl.BlockSpec((1, c2, lt_size), lambda nb, lt: (nb, 0, lt)),
                pl.BlockSpec((2 * K, c2), lambda nb, lt: (0, 0)),
                pl.BlockSpec((1, c2, 2 * K), lambda nb, lt: (nb, 0, 0)),
                pl.BlockSpec((1, c2, 1), lambda nb, lt: (nb, 0, 0)),
            ],
            out_specs=pl.BlockSpec((1, c2, lt_size), lambda nb, lt: (nb, 0, lt))),
        compiler_params=pltpu.CompilerParams(
            dimension_semantics=("parallel", "parallel"),
            vmem_limit_bytes=vmem_limit),
    )(xf, w2full, m2, sh2)

    if l_pad != L:
        out = out[:, :, :L]
    return out.reshape(n, c2, d, hgt, w)


# --------------------------------------------------------------------------------
# Pure-JAX reference (same math, no Pallas) for correctness checking.
# --------------------------------------------------------------------------------
def glore_ref(x, p):
    n, c2, d, hh, w = x.shape
    c = c2 // 2
    L = d * hh * w
    xf = x.reshape(n, c2, L).astype(jnp.float32)

    def one_half(xs_in, xp_in, w1, b1, w2):
        xs = jnp.einsum('sc,ncl->nsl', p['w_state'], xs_in) + p['b_state'][None]
        xp = jnp.einsum('kc,ncl->nkl', p['w_proj'], xp_in) + p['b_proj'][None]
        a = jnp.einsum('nsl,nkl->nsk', xs, xp)
        h = jnp.einsum('nsj,ij->nsi', a, w1) + b1[None] + a
        h = jnp.maximum(h, 0.0)
        rel = jnp.einsum('st,ntk->nsk', w2, h)
        xo = jnp.einsum('nsk,nkl->nsl', rel, xp)
        y = jnp.einsum('cs,nsl->ncl', p['w_ext'], xo)
        mean = jnp.mean(y, axis=(0, 2), keepdims=True)
        var = jnp.mean((y - mean) ** 2, axis=(0, 2), keepdims=True)
        yh = (y - mean) / jnp.sqrt(var + BN_EPS)
        yh = yh * p['bn_gamma'][None] + p['bn_beta'][None]
        return xs_in + yh

    x1, x2 = xf[:, :c], xf[:, c:]
    o1 = one_half(x1, x2, p['gcn_w1'][0], p['gcn_b1'][0], p['gcn_w2'][0])
    o2 = one_half(x2, x1, p['gcn_w1'][1], p['gcn_b1'][1], p['gcn_w2'][1])
    return jnp.concatenate([o1, o2], axis=1).reshape(x.shape)


def init_params(key, num_in, num_mid):
    """Deterministic synthetic parameters (shapes match the PyTorch module)."""
    S = 2 * num_mid   # num_s
    K = num_mid       # num_n
    ks = jax.random.split(key, 8)
    scale = 0.2
    return {
        'w_state': scale * jax.random.normal(ks[0], (S, num_in), jnp.float32),
        'b_state': scale * jax.random.normal(ks[1], (S, 1), jnp.float32),
        'w_proj':  scale * jax.random.normal(ks[2], (K, num_in), jnp.float32),
        'b_proj':  scale * jax.random.normal(ks[3], (K, 1), jnp.float32),
        # stacked (gcn1, gcn2)
        'gcn_w1':  scale * jax.random.normal(ks[4], (2, K, K), jnp.float32),
        'gcn_b1':  scale * jax.random.normal(ks[5], (2, 1, K), jnp.float32),
        'gcn_w2':  scale * jax.random.normal(ks[6], (2, S, S), jnp.float32),
        'w_ext':   scale * jax.random.normal(ks[7], (num_in, S), jnp.float32),
        'bn_gamma': jnp.ones((num_in, 1), jnp.float32),    # PyTorch BN default init
        'bn_beta':  jnp.zeros((num_in, 1), jnp.float32),
    }


if __name__ == "__main__":
    key = jax.random.PRNGKey(0)
    k_x, k_p = jax.random.split(key)

    num_in = 8          # channels per half -> input has 2*num_in = 16 channels
    num_mid = 4         # num_s = 8, num_n = 4
    n, d, h, w = 2, 2, 16, 15        # L = 480 (not a multiple of 128 -> exercises masking)
    x = jax.random.normal(k_x, (n, 2 * num_in, d, h, w), jnp.float32)
    params = init_params(k_p, num_in, num_mid)

    # small lane_tile so the multi-tile accumulation and padded-lane mask are exercised
    out = jax.block_until_ready(glore_unit(x, params, lane_tile=128))
    ref = jax.block_until_ready(glore_ref(x, params))

    assert out.shape == x.shape and out.dtype == jnp.float32
    max_err = float(jnp.max(jnp.abs(out - ref)))
    # Big streaming matmuls run at DEFAULT MXU precision (per perf review); tolerance
    # is sized for that.
    assert jnp.allclose(out, ref, atol=3e-2, rtol=3e-2), \
        f"mismatch vs. reference (max |err| = {max_err})"
    print("KERNEL_OK")
</pallas_src>

<mosaic_0001>
module attributes {stable_mosaic.version = 11 : i64} {
  func.func @_stats_kernel(%arg0: i32, %arg1: i32, %arg2: memref<1x16x128xf32, #tpu.memory_space<vmem>>, %arg3: memref<13x8xf32, #tpu.memory_space<vmem>>, %arg4: memref<13x1xf32, #tpu.memory_space<vmem>>, %arg5: memref<1x13x13xf32, #tpu.memory_space<vmem>>, %arg6: memref<1x4x4xf32, #tpu.memory_space<vmem>>, %arg7: memref<1x4x4xf32, #tpu.memory_space<vmem>>) attributes {dimension_semantics = [#tpu.dimension_semantics<parallel>, #tpu.dimension_semantics<arbitrary>], iteration_bounds = array<i64: 2, 4>, scalar_prefetch = 0 : i64, scratch_operands = 0 : i64, tpu.core_type = #tpu.core_type<tc>, window_params = [{transform_indices = @transform_0, window_bounds = array<i64: 1, 16, 128>}, {pipeline_mode = #tpu.pipeline_mode<synchronous>, transform_indices = @transform_1, window_bounds = array<i64: 13, 8>}, {pipeline_mode = #tpu.pipeline_mode<synchronous>, transform_indices = @transform_2, window_bounds = array<i64: 13, 1>}, {transform_indices = @transform_3, window_bounds = array<i64: 1, 13, 13>}, {transform_indices = @transform_4, window_bounds = array<i64: 1, 4, 4>}, {transform_indices = @transform_5, window_bounds = array<i64: 1, 4, 4>}]} {
    %c0_i32 = arith.constant 0 : i32
    %0 = arith.cmpi eq, %arg1, %c0_i32 : i32
    %1 = arith.extui %0 : i1 to i32
    %c0_i32_0 = arith.constant 0 : i32
    %2 = arith.cmpi ne, %1, %c0_i32_0 : i32
    scf.if %2 {
      %cst_31 = arith.constant 0.000000e+00 : f32
      %52 = vector.broadcast %cst_31 : f32 to vector<1x13x13xf32>
      %c0_32 = arith.constant 0 : index
      %c0_33 = arith.constant 0 : index
      %c0_34 = arith.constant 0 : index
      %53 = vector.load %arg5[%c0_32, %c0_33, %c0_34] : memref<1x13x13xf32, #tpu.memory_space<vmem>>, vector<1x13x13xf32>
      tpu.vector_store %arg5[%c0_32, %c0_33, %c0_34], %52 {strides = array<i32>} : memref<1x13x13xf32, #tpu.memory_space<vmem>>, vector<1x13x13xf32>,
      %cst_35 = arith.constant 0.000000e+00 : f32
      %54 = vector.broadcast %cst_35 : f32 to vector<1x4x4xf32>
      %c0_36 = arith.constant 0 : index
      %c0_37 = arith.constant 0 : index
      %c0_38 = arith.constant 0 : index
      %55 = vector.load %arg6[%c0_36, %c0_37, %c0_38] : memref<1x4x4xf32, #tpu.memory_space<vmem>>, vector<1x4x4xf32>
      tpu.vector_store %arg6[%c0_36, %c0_37, %c0_38], %54 {strides = array<i32>} : memref<1x4x4xf32, #tpu.memory_space<vmem>>, vector<1x4x4xf32>,
      %cst_39 = arith.constant 0.000000e+00 : f32
      %56 = vector.broadcast %cst_39 : f32 to vector<1x4x4xf32>
      %c0_40 = arith.constant 0 : index
      %c0_41 = arith.constant 0 : index
      %c0_42 = arith.constant 0 : index
      %57 = vector.load %arg7[%c0_40, %c0_41, %c0_42] : memref<1x4x4xf32, #tpu.memory_space<vmem>>, vector<1x4x4xf32>
      tpu.vector_store %arg7[%c0_40, %c0_41, %c0_42], %56 {strides = array<i32>} : memref<1x4x4xf32, #tpu.memory_space<vmem>>, vector<1x4x4xf32>,
    } else {
    }
    %c0 = arith.constant 0 : index
    %c0_1 = arith.constant 0 : index
    %c0_2 = arith.constant 0 : index
    %3 = vector.load %arg2[%c0, %c0_1, %c0_2] : memref<1x16x128xf32, #tpu.memory_space<vmem>>, vector<1x16x128xf32>
    %4 = vector.shape_cast %3 : vector<1x16x128xf32> to vector<16x128xf32>
    %c0_3 = arith.constant 0 : index
    %c0_4 = arith.constant 0 : index
    %5 = vector.load %arg3[%c0_3, %c0_4] : memref<13x8xf32, #tpu.memory_space<vmem>>, vector<13x8xf32>
    %c0_5 = arith.constant 0 : index
    %c0_6 = arith.constant 0 : index
    %6 = vector.load %arg4[%c0_5, %c0_6] : memref<13x1xf32, #tpu.memory_space<vmem>>, vector<13x1xf32>
    %7 = vector.extract_strided_slice %4 {offsets = [0, 0], sizes = [8, 128], strides = [1, 1]} : vector<16x128xf32> to vector<8x128xf32>
    %cst = arith.constant dense<0.000000e+00> : vector<13x128xf32>
    %8 = tpu.matmul %5, %7, %cst {dimension_numbers = #tpu.dot_dimension_numbers<[1], [0], [0], [1], [0, 0, 1, 1], [], []>} : vector<13x8xf32>, vector<8x128xf32>, vector<13x128xf32> -> vector<13x128xf32>
    %9 = vector.broadcast %6 : vector<13x1xf32> to vector<13x128xf32>
    %10 = arith.addf %8, %9 : vector<13x128xf32>
    %11 = vector.extract_strided_slice %4 {offsets = [8, 0], sizes = [8, 128], strides = [1, 1]} : vector<16x128xf32> to vector<8x128xf32>
    %cst_7 = arith.constant dense<0.000000e+00> : vector<13x128xf32>
    %12 = tpu.matmul %5, %11, %cst_7 {dimension_numbers = #tpu.dot_dimension_numbers<[1], [0], [0], [1], [0, 0, 1, 1], [], []>} : vector<13x8xf32>, vector<8x128xf32>, vector<13x128xf32> -> vector<13x128xf32>
    %13 = vector.broadcast %6 : vector<13x1xf32> to vector<13x128xf32>
    %14 = arith.addf %12, %13 : vector<13x128xf32>
    %15 = tpu.iota {dimensions = array<i32: 1>} : vector<1x128xi32>
    %c128_i32 = arith.constant 128 : i32
    %16 = arith.muli %arg1, %c128_i32 : i32
    %17 = vector.broadcast %16 : i32 to vector<1x128xi32>
    %18 = arith.addi %15, %17 : vector<1x128xi32>
    %c480_i32 = arith.constant 480 : i32
    %19 = vector.broadcast %c480_i32 : i32 to vector<1x128xi32>
    %20 = arith.cmpi slt, %18, %19 : vector<1x128xi32>
    %cst_8 = arith.constant 0.000000e+00 : f32
    %21 = vector.shape_cast %20 : vector<1x128xi1> to vector<1x128xi1>
    %22 = vector.broadcast %21 : vector<1x128xi1> to vector<13x128xi1>
    %23 = vector.broadcast %cst_8 : f32 to vector<13x128xf32>
    %24 = arith.select %22, %10, %23 : vector<13x128xi1>, vector<13x128xf32>
    %cst_9 = arith.constant 0.000000e+00 : f32
    %25 = vector.shape_cast %20 : vector<1x128xi1> to vector<1x128xi1>
    %26 = vector.broadcast %25 : vector<1x128xi1> to vector<13x128xi1>
    %27 = vector.broadcast %cst_9 : f32 to vector<13x128xf32>
    %28 = arith.select %26, %14, %27 : vector<13x128xi1>, vector<13x128xf32>
    %c0_10 = arith.constant 0 : index
    %c0_11 = arith.constant 0 : index
    %c0_12 = arith.constant 0 : index
    %29 = vector.load %arg5[%c0_10, %c0_11, %c0_12] : memref<1x13x13xf32, #tpu.memory_space<vmem>>, vector<1x13x13xf32>
    %30 = vector.shape_cast %29 : vector<1x13x13xf32> to vector<13x13xf32>
    "tpu.trace_start"() <{level = 10 : i32, message = "il,jl->ij"}> : () -> ()
    %cst_13 = arith.constant dense<0.000000e+00> : vector<13x13xf32>
    %31 = tpu.matmul %24, %28, %cst_13 {dimension_numbers = #tpu.dot_dimension_numbers<[1], [1], [0], [0], [0, 0, 1, 0], [], []>} : vector<13x128xf32>, vector<13x128xf32>, vector<13x13xf32> -> vector<13x13xf32>
    "tpu.trace_stop"() : () -> ()
    %32 = arith.addf %30, %31 : vector<13x13xf32>
    %c0_14 = arith.constant 0 : index
    %c0_15 = arith.constant 0 : index
    %c0_16 = arith.constant 0 : index
    %33 = vector.load %arg5[%c0_14, %c0_15, %c0_16] : memref<1x13x13xf32, #tpu.memory_space<vmem>>, vector<1x13x13xf32>
    %34 = vector.shape_cast %33 : vector<1x13x13xf32> to vector<13x13xf32>
    %35 = vector.shape_cast %32 : vector<13x13xf32> to vector<1x13x13xf32>
    tpu.vector_store %arg5[%c0_14, %c0_15, %c0_16], %35 {strides = array<i32>} : memref<1x13x13xf32, #tpu.memory_space<vmem>>, vector<1x13x13xf32>,
    %36 = vector.extract_strided_slice %24 {offsets = [0, 0], sizes = [4, 128], strides = [1, 1]} : vector<13x128xf32> to vector<4x128xf32>
    %37 = vector.extract_strided_slice %28 {offsets = [0, 0], sizes = [4, 128], strides = [1, 1]} : vector<13x128xf32> to vector<4x128xf32>
    %c0_17 = arith.constant 0 : index
    %c0_18 = arith.constant 0 : index
    %c0_19 = arith.constant 0 : index
    %38 = vector.load %arg6[%c0_17, %c0_18, %c0_19] : memref<1x4x4xf32, #tpu.memory_space<vmem>>, vector<1x4x4xf32>
    %39 = vector.shape_cast %38 : vector<1x4x4xf32> to vector<4x4xf32>
    "tpu.trace_start"() <{level = 10 : i32, message = "kl,jl->kj"}> : () -> ()
    %cst_20 = arith.constant dense<0.000000e+00> : vector<4x4xf32>
    %40 = tpu.matmul %37, %37, %cst_20 {dimension_numbers = #tpu.dot_dimension_numbers<[1], [1], [0], [0], [0, 0, 1, 0], [], []>} : vector<4x128xf32>, vector<4x128xf32>, vector<4x4xf32> -> vector<4x4xf32>
    "tpu.trace_stop"() : () -> ()
    %41 = arith.addf %39, %40 : vector<4x4xf32>
    %c0_21 = arith.constant 0 : index
    %c0_22 = arith.constant 0 : index
    %c0_23 = arith.constant 0 : index
    %42 = vector.load %arg6[%c0_21, %c0_22, %c0_23] : memref<1x4x4xf32, #tpu.memory_space<vmem>>, vector<1x4x4xf32>
    %43 = vector.shape_cast %42 : vector<1x4x4xf32> to vector<4x4xf32>
    %44 = vector.shape_cast %41 : vector<4x4xf32> to vector<1x4x4xf32>
    tpu.vector_store %arg6[%c0_21, %c0_22, %c0_23], %44 {strides = array<i32>} : memref<1x4x4xf32, #tpu.memory_space<vmem>>, vector<1x4x4xf32>,
    %c0_24 = arith.constant 0 : index
    %c0_25 = arith.constant 0 : index
    %c0_26 = arith.constant 0 : index
    %45 = vector.load %arg7[%c0_24, %c0_25, %c0_26] : memref<1x4x4xf32, #tpu.memory_space<vmem>>, vector<1x4x4xf32>
    %46 = vector.shape_cast %45 : vector<1x4x4xf32> to vector<4x4xf32>
    "tpu.trace_start"() <{level = 10 : i32, message = "kl,jl->kj"}> : () -> ()
    %cst_27 = arith.constant dense<0.000000e+00> : vector<4x4xf32>
    %47 = tpu.matmul %36, %36, %cst_27 {dimension_numbers = #tpu.dot_dimension_numbers<[1], [1], [0], [0], [0, 0, 1, 0], [], []>} : vector<4x128xf32>, vector<4x128xf32>, vector<4x4xf32> -> vector<4x4xf32>
    "tpu.trace_stop"() : () -> ()
    %48 = arith.addf %46, %47 : vector<4x4xf32>
    %c0_28 = arith.constant 0 : index
    %c0_29 = arith.constant 0 : index
    %c0_30 = arith.constant 0 : index
    %49 = vector.load %arg7[%c0_28, %c0_29, %c0_30] : memref<1x4x4xf32, #tpu.memory_space<vmem>>, vector<1x4x4xf32>
    %50 = vector.shape_cast %49 : vector<1x4x4xf32> to vector<4x4xf32>
    %51 = vector.shape_cast %48 : vector<4x4xf32> to vector<1x4x4xf32>
    tpu.vector_store %arg7[%c0_28, %c0_29, %c0_30], %51 {strides = array<i32>} : memref<1x4x4xf32, #tpu.memory_space<vmem>>, vector<1x4x4xf32>,
    return
  }
  func.func @transform_0(%arg0: i32, %arg1: i32) -> (i32, i32, i32) {
    %c0_i32 = arith.constant 0 : i32
    %c0_i32_0 = arith.constant 0 : i32
    return %arg0, %c0_i32, %arg1 : i32, i32, i32
  }
  func.func @transform_1(%arg0: i32, %arg1: i32) -> (i32, i32) {
    %c0_i32 = arith.constant 0 : i32
    %c0_i32_0 = arith.constant 0 : i32
    %c0_i32_1 = arith.constant 0 : i32
    return %c0_i32, %c0_i32_0 : i32, i32
  }
  func.func @transform_2(%arg0: i32, %arg1: i32) -> (i32, i32) {
    %c0_i32 = arith.constant 0 : i32
    %c0_i32_0 = arith.constant 0 : i32
    %c0_i32_1 = arith.constant 0 : i32
    return %c0_i32, %c0_i32_0 : i32, i32
  }
  func.func @transform_3(%arg0: i32, %arg1: i32) -> (i32, i32, i32) {
    %c0_i32 = arith.constant 0 : i32
    %c0_i32_0 = arith.constant 0 : i32
    %c0_i32_1 = arith.constant 0 : i32
    return %arg0, %c0_i32, %c0_i32_0 : i32, i32, i32
  }
  func.func @transform_4(%arg0: i32, %arg1: i32) -> (i32, i32, i32) {
    %c0_i32 = arith.constant 0 : i32
    %c0_i32_0 = arith.constant 0 : i32
    %c0_i32_1 = arith.constant 0 : i32
    return %arg0, %c0_i32, %c0_i32_0 : i32, i32, i32
  }
  func.func @transform_5(%arg0: i32, %arg1: i32) -> (i32, i32, i32) {
    %c0_i32 = arith.constant 0 : i32
    %c0_i32_0 = arith.constant 0 : i32
    %c0_i32_1 = arith.constant 0 : i32
    return %arg0, %c0_i32, %c0_i32_0 : i32, i32, i32
  }
}

module attributes {stable_mosaic.version = 11 : i64} {
  func.func @_apply_kernel(%arg0: i32, %arg1: i32, %arg2: memref<1x16x128xf32, #tpu.memory_space<vmem>>, %arg3: memref<8x16xf32, #tpu.memory_space<vmem>>, %arg4: memref<1x16x8xf32, #tpu.memory_space<vmem>>, %arg5: memref<1x16x1xf32, #tpu.memory_space<vmem>>, %arg6: memref<1x16x128xf32, #tpu.memory_space<vmem>>) attributes {dimension_semantics = [#tpu.dimension_semantics<parallel>, #tpu.dimension_semantics<parallel>], iteration_bounds = array<i64: 2, 4>, scalar_prefetch = 0 : i64, scratch_operands = 0 : i64, tpu.core_type = #tpu.core_type<tc>, window_params = [{transform_indices = @transform_0, window_bounds = array<i64: 1, 16, 128>}, {pipeline_mode = #tpu.pipeline_mode<synchronous>, transform_indices = @transform_1, window_bounds = array<i64: 8, 16>}, {transform_indices = @transform_2, window_bounds = array<i64: 1, 16, 8>}, {transform_indices = @transform_3, window_bounds = array<i64: 1, 16, 1>}, {transform_indices = @transform_4, window_bounds = array<i64: 1, 16, 128>}]} {
    %c0 = arith.constant 0 : index
    %c0_0 = arith.constant 0 : index
    %c0_1 = arith.constant 0 : index
    %0 = vector.load %arg2[%c0, %c0_0, %c0_1] : memref<1x16x128xf32, #tpu.memory_space<vmem>>, vector<1x16x128xf32>
    %1 = vector.shape_cast %0 : vector<1x16x128xf32> to vector<16x128xf32>
    %c0_2 = arith.constant 0 : index
    %c0_3 = arith.constant 0 : index
    %2 = vector.load %arg3[%c0_2, %c0_3] : memref<8x16xf32, #tpu.memory_space<vmem>>, vector<8x16xf32>
    %cst = arith.constant dense<0.000000e+00> : vector<8x128xf32>
    %3 = tpu.matmul %2, %1, %cst {dimension_numbers = #tpu.dot_dimension_numbers<[1], [0], [0], [1], [0, 0, 1, 1], [], []>} : vector<8x16xf32>, vector<16x128xf32>, vector<8x128xf32> -> vector<8x128xf32>
    %c0_4 = arith.constant 0 : index
    %c0_5 = arith.constant 0 : index
    %c0_6 = arith.constant 0 : index
    %4 = vector.load %arg4[%c0_4, %c0_5, %c0_6] : memref<1x16x8xf32, #tpu.memory_space<vmem>>, vector<1x16x8xf32>
    %5 = vector.shape_cast %4 : vector<1x16x8xf32> to vector<16x8xf32>
    %cst_7 = arith.constant dense<0.000000e+00> : vector<16x128xf32>
    %6 = tpu.matmul %5, %3, %cst_7 {dimension_numbers = #tpu.dot_dimension_numbers<[1], [0], [0], [1], [0, 0, 1, 1], [], []>} : vector<16x8xf32>, vector<8x128xf32>, vector<16x128xf32> -> vector<16x128xf32>
    %7 = arith.addf %1, %6 : vector<16x128xf32>
    %c0_8 = arith.constant 0 : index
    %c0_9 = arith.constant 0 : index
    %c0_10 = arith.constant 0 : index
    %8 = vector.load %arg5[%c0_8, %c0_9, %c0_10] : memref<1x16x1xf32, #tpu.memory_space<vmem>>, vector<1x16x1xf32>
    %9 = vector.shape_cast %8 : vector<1x16x1xf32> to vector<16x1xf32>
    %10 = vector.broadcast %9 : vector<16x1xf32> to vector<16x128xf32>
    %11 = arith.addf %7, %10 : vector<16x128xf32>
    %c0_11 = arith.constant 0 : index
    %c0_12 = arith.constant 0 : index
    %c0_13 = arith.constant 0 : index
    %12 = vector.load %arg6[%c0_11, %c0_12, %c0_13] : memref<1x16x128xf32, #tpu.memory_space<vmem>>, vector<1x16x128xf32>
    %13 = vector.shape_cast %12 : vector<1x16x128xf32> to vector<16x128xf32>
    %14 = vector.shape_cast %11 : vector<16x128xf32> to vector<1x16x128xf32>
    tpu.vector_store %arg6[%c0_11, %c0_12, %c0_13], %14 {strides = array<i32>} : memref<1x16x128xf32, #tpu.memory_space<vmem>>, vector<1x16x128xf32>,
    return
  }
  func.func @transform_0(%arg0: i32, %arg1: i32) -> (i32, i32, i32) {
    %c0_i32 = arith.constant 0 : i32
    %c0_i32_0 = arith.constant 0 : i32
    return %arg0, %c0_i32, %arg1 : i32, i32, i32
  }
  func.func @transform_1(%arg0: i32, %arg1: i32) -> (i32, i32) {
    %c0_i32 = arith.constant 0 : i32
    %c0_i32_0 = arith.constant 0 : i32
    %c0_i32_1 = arith.constant 0 : i32
    return %c0_i32, %c0_i32_0 : i32, i32
  }
  func.func @transform_2(%arg0: i32, %arg1: i32) -> (i32, i32, i32) {
    %c0_i32 = arith.constant 0 : i32
    %c0_i32_0 = arith.constant 0 : i32
    %c0_i32_1 = arith.constant 0 : i32
    return %arg0, %c0_i32, %c0_i32_0 : i32, i32, i32
  }
  func.func @transform_3(%arg0: i32, %arg1: i32) -> (i32, i32, i32) {
    %c0_i32 = arith.constant 0 : i32
    %c0_i32_0 = arith.constant 0 : i32
    %c0_i32_1 = arith.constant 0 : i32
    return %arg0, %c0_i32, %c0_i32_0 : i32, i32, i32
  }
  func.func @transform_4(%arg0: i32, %arg1: i32) -> (i32, i32, i32) {
    %c0_i32 = arith.constant 0 : i32
    %c0_i32_0 = arith.constant 0 : i32
    return %arg0, %c0_i32, %arg1 : i32, i32, i32
  }
}

</mosaic_0001>

<bundles_post_ra>
// kernel: glore_unit.3
= control target key start
LH: loop header
LB: loop body
LE: loop exit
PB: predicated region body
PF: predicated region fallthrough
CT: control target
= control target key end

     0   :  { %s801_s15 = smov 0   ;;  %s803_s16 = smov 0   ;;  %s912_s0 = inlined_call_operand.vmem [shape: f32[2,16,512], index: 0, kind: input, shape index: {}]   ;;  %s913_s1 = inlined_call_operand.vmem [shape: f32[8,16], index: 1, kind: input, shape index: {}]   ;;  %s914_s2 = inlined_call_operand.vmem [shape: f32[2,16,8], index: 2, kind: input, shape index: {}]   ;;  %s915_s3 = inlined_call_operand.vmem [shape: f32[2,16,1], index: 3, kind: input, shape index: {}]   ;;  %s916_s4 = inlined_call_operand.vmem [shape: f32[2,16,512], index: 4, kind: output, shape index: {}]  }
   0x1   :  { %s805_s17 = smov 0   ;;  %s807_s18 = smov 0  }
   0x2   :  { %s809_s19 = smov 0   ;;  %s811_s20 = smov 0  }
   0x3   :  { %s813_s21 = smov 0  }
   0x4 LB: > { %s23_s22 = sadd.s32 1, %s762_s19  ;;  %s26_s23 = sadd.s32 1, %s766_s20  ;;  %s770_s21 = sphi %s813_s21, %s14_s21   ;;  %s766_s20 = sphi %s811_s20, %s923_s20   ;;  %s762_s19 = sphi %s809_s19, %s922_s19   ;;  %s758_s18 = sphi %s807_s18, %s921_s18   ;;  %s754_s17 = sphi %s805_s17, %s920_s17   ;;  %s750_s16 = sphi %s803_s16, %s919_s16   ;;  %s746_s15 = sphi %s801_s15, %s918_s15  }
   0x5   : > { %p24_p0 = scmp.ge.s32.totalorder %s23_s22, 4  ;;  %s610_s24 = sadd.s32 4294967295, %s770_s21  }
   0x6   : > { %p42_p1 = scmp.ne.s32.totalorder %s750_s16, %s746_s15  ;;  %p43_p2 = scmp.eq.s32.totalorder %s770_s21, 0 }
   0x7   : > { %s925_s22 = smov (%p24_p0, %s23_s22), 0  ;;  %s927_s23 = smov (!%p24_p0, %s26_s23), %s766_s20 }
   0x8   : > { %p28_p3 = scmp.ge.s32.totalorder %s927_s23, 2  ;;  %p147_p4 = scmp.eq.s32.totalorder %s610_s24, 7 }
   0x9   : > { %s31_s25 = ssub.s32 %s762_s19, %s925_s22  ;;  %p44_p5 = por %p43_p2, %p42_p1 }
   0xa   : > { %s929_s23 = smov (%p28_p3, %s927_s23), 0  ;;  %p849_p6 = por %p147_p4, %p42_p1 }
   0xb   : > { %s30_s27 = ssub.s32 %s766_s20, %s929_s23  ;;  %s35_s29 = sadd.s32 1, %s750_s16 }
   0xc   : > { %s32_s28 = sor.u32 %s31_s25, %s30_s27  ;;  %p613_p8 = scmp.ge.s32.totalorder %s770_s21, 8 }
   0xd   : > { %p33_p7 = scmp.eq.s32.totalorder %s32_s28, 0 }
   0xe   : > { %172 = sbr.rel (%p613_p8) target bundleno = 29 (0x1d), region = 20 }
   0xf   : > { %s857_s30 = scalar_select %p33_p7, %s750_s16, %s35_s29  }
  0x15   : > { %175 = sbr.rel (!%p44_p5) target bundleno = 29 (0x1d), region = 24  ;;  %s177_s5 = sand.u32 (%p44_p5), 1, %s750_s16  }
  0x16   : > { %s615_s6 = sshll.u32 (%p44_p5), %s766_s20, 3  ;;  %s614_s7 = sshll.u32 (%p44_p5), %s177_s5, 4 }
  0x17   : > { %s181_s8 = sadd.s32 (%p44_p5), %s762_s19, %s615_s6  ;;  %s179_s13 = scalar_lea.vmem (%p44_p5), [#allocation2], %s614_s7 }
  0x18   : > { %s616_s9 = sshll.u32 (%p44_p5), %s181_s8, 3 }
  0x19   : > { %s183_s12 = scalar_lea.vmem (%p44_p5), %s912_s0, %s616_s9 }
  0x1a   : > { %v213_v0 = vld [vmem:[%s183_s12] sm:$0xff] (%p44_p5) }
  0x1b   : > { %v215_v1 = vld [vmem:[%s183_s12 + $0x20] sm:$0xff] (%p44_p5)  ;;  %214 = vst [vmem:[%s179_s13] sm:$0xff] (%p44_p5), %v213_v0 }
  0x1c   : > { %216 = vst [vmem:[%s179_s13 + $0x8] sm:$0xff] %v215_v1 }
  0x1d PF: > { %p617_p9 = scmp.ge.s32.totalorder %s770_s21, 1  ;;  %p237_p10 = scmp.lt.s32.totalorder %s770_s21, 9 }
  0x1f   : > { %p238_p11 = pnand %p617_p9, %p237_p10 }
  0x20   : > { %s244_s14 = sand.u32 (!%p238_p11), 1, %s746_s15   ;;  %v772_v2 = vmov (!%p238_p11), 0.0|0.0   ;;  %vm773_vm0 = vmmov (!%p238_p11), 0   ;;  %v774_v3 = vmov (!%p238_p11), 0.0   ;;  %v290_v7 = vld [vmem:[%s913_s1] sm:$0xff] (!%p238_p11)  ;;  %vm291_vm1 = vcmask (!%p238_p11), 130048  }
  0x21   : > { %241 = sbr.rel (%p238_p11) target bundleno = 481 (0x1e1), region = 70  ;;  %652 = vmatprep.subr.bf16.mxu0 (!%p238_p11), %v772_v2  ;;  %s869_s24 = sshll.u32 (!%p238_p11), %s244_s14, 4  ;;  %644 = vmatprep.mubr.msk.f32.mxu0 (!%p238_p11), %vm773_vm0, %v774_v3  ;;  %vm367_vm2 = vcmask (!%p238_p11), 64512   ;;  %v775_v9 = vmov (!%p238_p11), 0  }
  0x22   : > { %s246_s25 = scalar_lea.vmem (!%p238_p11), [#allocation2], %s869_s24  ;;  %p278_p12 = scmp.lt.s32.totalorder (!%p238_p11), %s758_s18, 1  ;;  %715 = vset.pattern.permute.xlu0 (!%p238_p11), %v775_v9 }
  0x23   : > { %v288_v4 = vld [vmem:[%s246_s25] sm:$0xff] (!%p238_p11)  ;;  %v289_v5 = vld [vmem:[%s246_s25 + $0x8] sm:$0xff] (!%p238_p11)  ;;  %s277_s11 = scalar_lea.vmem (!%p238_p11), [#allocation3], %s869_s24 }
  0x24   : > { %v653_v6 = vpack.c.bf16 (!%p238_p11), %v289_v5, %v288_v4 }
  0x26   : > { %654 = vmatpush3.bf16.msra.mxu0 (!%p238_p11), %v653_v6 }
  0x28   : > { %s279_s15 = scalar_select %p278_p12, %s758_s18, 1 }
  0x29   : > { %645 = vmatmul.mubr.msk.f32.vlgmr.msra.gmra.mrb[0].mxu0 %vm291_vm1, %v290_v7  ;;  %s628_s12 = sshll.u32 (%p849_p6), %s758_s18, 3 }
  0x2a   : > { %s632_s29 = sshll.u32 %s279_s15, 4  ;;  %s475_s13 = sadd.s32 (%p849_p6), %s754_s17, %s628_s12 }
  0x2b   : > { %s282_s7 = scalar_lea.vmem %s914_s2, %s632_s29  ;;  %s287_s10 = scalar_lea.vmem %s915_s3, %s632_s29 }
  0x2c   : > { %v365_v8 = vld [vmem:[%s282_s7] sm:$0xff]  ;;  %v452_v11 = vld [vmem:[%s287_s10 + $0x8] sm:$0xff]  ;;  %s629_s14 = sshll.u32 (%p849_p6), %s475_s13, 3 }
  0x2d   : > { %649 = vmatprep.mubr.msk.f32.mxu1 %vm367_vm2, %v365_v8  ;;  %v451_v10 = vld [vmem:[%s287_s10] sm:$0xff]  ;;  %v366_v13 = vld [vmem:[%s282_s7 + $0x8] sm:$0xff]  ;;  %s477_s28 = scalar_lea.vmem (%p849_p6), %s916_s4, %s629_s14 }
  0x2e   : > { %455 = vperm.xlu0 %715, %v451_v10  }
  0x32   : > { %460 = vperm.xlu0 %715, %v452_v11  }
  0xad   : > { %v456_v15 = vpop.permute.xlu0 %455 }
  0xb1   : > { %v461_v19 = vpop.permute.xlu0 %460 }
  0xfc   : > { %v361_v12 = vpop.f32.mrb[0].mxu0 }
  0xfd   : > { %v646_v14 = vpop.f32.mrb[1].mxu0  ;;  %647 = vmatprep.subr.mxu1 %v361_v12 }
  0xfe   : > { %648 = vmatpush3.msra.mxu1 %v361_v12 }
  0xff   : > { %650 = vmatmul.mubr.msk.f32.vlgmr.msra.gmra.mrb[0].mxu1 %vm367_vm2, %v366_v13 }
 0x1d2   : > { %v651_v16 = vpop.f32.mrb[0].mxu1  ;;  %473 = sbr.rel (!%p849_p6) target bundleno = 481 (0x1e1), region = 78 }
 0x1d3   : > { %v450_v17 = vadd.f32 %v651_v16, %v289_v5  ;;  %v440_v18 = vpop.f32.mrb[1].mxu1 }
 0x1d4   : > { %v449_v20 = vadd.f32 %v440_v18, %v288_v4 }
 0x1d5   : > { %v464_v21 = vadd.f32 %v461_v19, %v450_v17 }
 0x1d6   : > { %v463_v22 = vadd.f32 %v456_v15, %v449_v20 }
 0x1d7   : > { %466 = vst [vmem:[%s277_s11 + $0x8] sm:$0xff] %v464_v21 }
 0x1d8   : > { %465 = vst [vmem:[%s277_s11] sm:$0xff] %v463_v22 }
 0x1de   : > { %v509_v24 = vld [vmem:[%s277_s11 + $0x8] sm:$0xff] }
 0x1df   : > { %v507_v23 = vld [vmem:[%s277_s11] sm:$0xff]  ;;  %510 = vst [vmem:[%s477_s28 + $0x20] sm:$0xff] %v509_v24 }
 0x1e0   : > { %508 = vst [vmem:[%s477_s28] sm:$0xff] %v507_v23 }
 0x1e1 PF: > { %s14_s21 = sadd.s32 1, %s770_s21   ;;  %s918_s15 = smov %s750_s16 }
 0x1e2   : > { %p11_p13 = scmp.ge.s32.totalorder %s14_s21, 10   ;;  %s919_s16 = smov %s857_s30 }
 0x1e3   : > { %s920_s17 = smov %s762_s19  ;;  %s921_s18 = smov %s766_s20 }
 0x1e4   : > { %s922_s19 = smov %s925_s22  ;;  %s923_s20 = smov %s929_s23 }
 0x1e5   :  { %13 = sbr.rel (!%p11_p13) target bundleno = 4 (0x4), region = 153 }

// kernel: glore_unit.2
= control target key start
LH: loop header
LB: loop body
LE: loop exit
PB: predicated region body
PF: predicated region fallthrough
CT: control target
= control target key end

     0   :  { %s1090_s18 = smov 0   ;;  %s1092_s19 = smov 0   ;;  %s1227_s0 = inlined_call_operand.vmem [shape: f32[2,16,512], index: 0, kind: input, shape index: {}]   ;;  %s1228_s1 = inlined_call_operand.vmem [shape: f32[13,8], index: 1, kind: input, shape index: {}]   ;;  %s1229_s2 = inlined_call_operand.vmem [shape: f32[13,1], index: 2, kind: input, shape index: {}]   ;;  %s1230_s3 = inlined_call_operand.vmem [shape: f32[2,13,13], index: 3, kind: output, shape index: {0}]   ;;  %s1231_s4 = inlined_call_operand.vmem [shape: f32[2,4,4], index: 4, kind: output, shape index: {1}]   ;;  %s1232_s5 = inlined_call_operand.vmem [shape: f32[2,4,4], index: 5, kind: output, shape index: {2}]  }
   0x1   :  { %s1094_s20 = smov 0   ;;  %s1096_s21 = smov 0  }
   0x2   :  { %s1098_s22 = smov 0   ;;  %s1100_s23 = smov 0  }
   0x3   :  { %s1102_s24 = smov 0  }
   0x4 LB: > { %s25_s25 = sadd.s32 1, %s1046_s22  ;;  %s28_s26 = sadd.s32 1, %s1050_s23  ;;  %s1054_s24 = sphi %s1102_s24, %s16_s24   ;;  %s1050_s23 = sphi %s1100_s23, %s1238_s23   ;;  %s1046_s22 = sphi %s1098_s22, %s1237_s22   ;;  %s1042_s21 = sphi %s1096_s21, %s1236_s21   ;;  %s1038_s20 = sphi %s1094_s20, %s1235_s20   ;;  %s1034_s19 = sphi %s1092_s19, %s1234_s19   ;;  %s1030_s18 = sphi %s1090_s18, %s1233_s18  }
   0x5   : > { %p26_p0 = scmp.ge.s32.totalorder %s25_s25, 4  ;;  %p44_p1 = scmp.ne.s32.totalorder %s1034_s19, %s1030_s18 }
   0x6   : > { %p45_p2 = scmp.eq.s32.totalorder %s1054_s24, 0  ;;  %s37_s30 = sadd.s32 1, %s1034_s19 }
   0x7   : > { %s1240_s25 = smov (%p26_p0, %s25_s25), 0  ;;  %s1242_s26 = smov (!%p26_p0, %s28_s26), %s1050_s23 }
   0x8   : > { %p46_p3 = por %p45_p2, %p44_p1  ;;  %p30_p4 = scmp.ge.s32.totalorder %s1242_s26, 2 }
   0x9   : > { %s33_s27 = ssub.s32 %s1046_s22, %s1240_s25  ;;  %p865_p6 = scmp.ge.s32.totalorder %s1054_s24, 8 }
   0xa   : > { %s1244_s26 = smov (%p30_p4, %s1242_s26), 0 }
   0xb   : > { %s32_s28 = ssub.s32 %s1050_s23, %s1244_s26  ;;  %196 = sbr.rel (%p865_p6) target bundleno = 26 (0x1a), region = 24 }
   0xc   : > { %s34_s29 = sor.u32 %s33_s27, %s32_s28 }
   0xd   : > { %p35_p5 = scmp.eq.s32.totalorder %s34_s29, 0 }
   0xf   : > { %s1141_s6 = scalar_select %p35_p5, %s1034_s19, %s37_s30  }
  0x12   : > { %199 = sbr.rel (!%p46_p3) target bundleno = 26 (0x1a), region = 28  ;;  %s201_s7 = sand.u32 (%p46_p3), 1, %s1034_s19  }
  0x13   : > { %s867_s8 = sshll.u32 (%p46_p3), %s1050_s23, 3  ;;  %s866_s9 = sshll.u32 (%p46_p3), %s201_s7, 4 }
  0x14   : > { %s205_s10 = sadd.s32 (%p46_p3), %s1046_s22, %s867_s8  ;;  %s203_s15 = scalar_lea.vmem (%p46_p3), [#allocation2], %s866_s9 }
  0x15   : > { %s868_s11 = sshll.u32 (%p46_p3), %s205_s10, 3 }
  0x16   : > { %s207_s14 = scalar_lea.vmem (%p46_p3), %s1227_s0, %s868_s11 }
  0x17   : > { %v237_v0 = vld [vmem:[%s207_s14] sm:$0xff] (%p46_p3) }
  0x18   : > { %v239_v1 = vld [vmem:[%s207_s14 + $0x20] sm:$0xff] (%p46_p3)  ;;  %238 = vst [vmem:[%s203_s15] sm:$0xff] (%p46_p3), %v237_v0 }
  0x19   : > { %240 = vst [vmem:[%s203_s15 + $0x8] sm:$0xff] %v239_v1 }
  0x1a PF: > { %p869_p7 = scmp.ge.s32.totalorder %s1054_s24, 1  ;;  %p245_p8 = scmp.lt.s32.totalorder %s1054_s24, 9 }
  0x1c   : > { %p246_p9 = pnand %p869_p7, %p245_p8 }
  0x1d   : > { %s252_s16 = sand.u32 (!%p246_p9), 1, %s1030_s18   ;;  %p287_p10 = scmp.lt.s32.totalorder (!%p246_p9), %s1042_s21, 1 }
  0x1e   : > { %249 = sbr.rel (%p246_p9) target bundleno = 489 (0x1e9), region = 66  ;;  %s870_s17 = sshll.u32 (!%p246_p9), %s252_s16, 4 }
  0x1f   : > { %s254_s18 = scalar_lea.vmem (!%p246_p9), [#allocation2], %s870_s17  ;;  %p875_p11 = scmp.ne.s32.totalorder (!%p246_p9), %s1038_s20, 0 }
  0x25   : > { %s1246_s21 = smov (!%p287_p10, %s1042_s21), 1  ;;  %303 = sbr.rel (%p875_p11) target bundleno = 44 (0x2c), region = 74 }
  0x26   : > { %s891_s27 = sshll.u32 %s1246_s21, 4  ;;  %s873_s28 = sshll.u32 %s1246_s21, 2  ;;  %vm304_vm0 = vcmask (!%p875_p11), 105472   ;;  %vm306_vm1 = vcmask (!%p875_p11), 102400   ;;  %vm308_vm2 = vcmask (!%p875_p11), 27648   ;;  %v1056_v2 = vmov (!%p875_p11), 0.0  }
  0x27   : > { %s1158_s7 = scalar_lea.vmem %s1230_s3, %s891_s27  ;;  %s1163_s10 = scalar_lea.vmem %s1231_s4, %s873_s28 }
  0x28   : > { %s1168_s13 = scalar_lea.vmem %s1232_s5, %s873_s28  ;;  %305 = vst.msk [vmem:[%s1158_s7] sm:$0xff] (!%p875_p11), %vm304_vm0, %v1056_v2 }
  0x29   : > { %307 = vst.msk [vmem:[%s1158_s7 + $0x8] sm:$0x1f] (!%p875_p11), %vm306_vm1, %v1056_v2 }
  0x2a   : > { %309 = vst.msk [vmem:[%s1163_s10] sm:$0xf] (!%p875_p11), %vm308_vm2, %v1056_v2  ;;  %310 = vst.msk [vmem:[%s1168_s13] sm:$0xf] (!%p875_p11), %vm308_vm2, %v1056_v2 }
  0x2c PF: > { %v311_v3 = vld [vmem:[%s254_s18] sm:$0xff]  ;;  %v312_v4 = vld [vmem:[%s254_s18 + $0x8] sm:$0xff]  ;;  %vm327_vm3 = vcmask 64512   ;;  %v1057_v8 = vmov 0   ;;  %v1058_v10 = vmov 0.0   ;;  %vm1059_vm4 = vmmov 0  }
  0x2d   : > { %v313_v5 = vld [vmem:[%s1228_s1] sm:$0xff]  ;;  %906 = vmatprep.subr.mxu0 %v311_v3  ;;  %911 = vmatprep.subr.mxu1 %v312_v4  ;;  %v314_v6 = vld [vmem:[%s1228_s1 + $0x8] sm:$0x1f]  ;;  %v484_v11 = vlaneseq  ;;  %s880_s30 = sshll.u32 %s1038_s20, 7  ;;  %vm651_vm7 = vcmask 27648   ;;  %vm577_vm8 = vcmask 102400  }
  0x2e   : > { %907 = vmatpush3.msra.mxu0 %v311_v3  ;;  %908 = vmatprep.mubr.msk.f32.mxu0 %vm327_vm3, %v313_v5  ;;  %v315_v7 = vld [vmem:[%s1229_s2] sm:$0xff]  ;;  %v316_v9 = vld [vmem:[%s1229_s2 + $0x8] sm:$0x1f]  ;;  %v487_v14 = vstv %s880_s30  ;;  %vm575_vm9 = vcmask 105472  }
  0x2f   : > { %912 = vmatpush3.msra.mxu1 %v312_v4  ;;  %913 = vmatprep.mubr.msk.f32.mxu1 %vm327_vm3, %v313_v5  ;;  %v485_v12 = vand.u32 127, %v484_v11  ;;  %v496_v35 = vld [vmem:[%s1158_s7] sm:$0xff] }
  0x30   : > { %909 = vmatmul.mubr.msk.f32.vlgmr.msra.gmra.mrb[0].mxu0 %vm327_vm3, %v314_v6  ;;  %914 = vmatmul.mubr.msk.f32.vlgmr.msra.gmra.mrb[0].mxu1 %vm327_vm3, %v314_v6  ;;  %v497_v34 = vld [vmem:[%s1158_s7 + $0x8] sm:$0x1f] }
  0x31   : > { %999 = vset.pattern.permute.xlu0 %v1057_v8  ;;  %923 = vmatprep.subr.mxu1 %v1058_v10  ;;  %v488_v15 = vadd.s32 %v487_v14, %v485_v12  ;;  %v579_v26 = vld [vmem:[%s1163_s10] sm:$0xf] }
  0x32   : > { %319 = vperm.xlu0 %999, %v315_v7   ;;  %925 = vmatprep.mubr.msk.f32.mxu1 %vm1059_vm4, %v1058_v10  ;;  %v653_v30 = vld [vmem:[%s1168_s13] sm:$0xf] }
  0x33   : > { %vm489_vm5 = vcmp.lt.s32.totalorder %v488_v15, 480 }
  0x34   : > { %vm934_vm6 = vmpackc.low %vm489_vm5, %vm489_vm5 }
  0x36   : > { %324 = vperm.xlu0 %999, %v316_v9  }
  0xb1   : > { %v320_v13 = vpop.permute.xlu0 %319 }
  0xb5   : > { %v325_v16 = vpop.permute.xlu0 %324 }
 0x103   : > { %v910_v17 = vpop.f32.mrb[0].mxu0  ;;  %v915_v18 = vpop.f32.mrb[0].mxu1 }
 0x104   : > { %v481_v19 = vadd.f32 %v915_v18, %v325_v16  ;;  %v400_v20 = vpop.f32.mrb[1].mxu0  ;;  %v475_v21 = vpop.f32.mrb[1].mxu1  ;;  %v406_v25 = vadd.f32 %v910_v17, %v325_v16 }
 0x105   : > { %v401_v22 = vadd.f32 %v400_v20, %v320_v13  ;;  %v476_v23 = vadd.f32 %v475_v21, %v320_v13 }
 0x107   : > { %v933_v24 = vpack.c.bf16 %v481_v19, %v476_v23  ;;  %920 = vmatprep.mubr.msk.f32.mxu0 %vm489_vm5, %v401_v22  ;;  %924 = vmatpush3.xpose.msk.msra.mxu1 %vm489_vm5, %v476_v23 }
 0x108   : > { %928 = vmatprep.subr.mxu1 %v1058_v10 }
 0x109   : > { %935 = vmatprep.subr.msk.bf16.mxu0 %vm934_vm6, %v933_v24 }
 0x10a   : > { %938 = vmatpush3.bf16.xpose.msk.msra.mxu0 %vm934_vm6, %v933_v24  ;;  %926 = vmatmul.mubr.msk.f32.vlgmr.msra.gmra.mrb[2].mxu1 %vm489_vm5, %v476_v23 }
 0x10b   : > { %929 = vmatpush3.xpose.msk.msra.mxu1 %vm489_vm5, %v401_v22  ;;  %930 = vmatprep.mubr.msk.f32.mxu1 %vm1059_vm4, %v1058_v10 }
 0x10e   : > { %931 = vmatmul.mubr.msk.f32.vlgmr.msra.gmra.mrb[4].mxu1 %vm489_vm5, %v401_v22 }
 0x111   : > { %921 = vmatmul.mubr.msk.f32.vlgmr.msra.gmra.mrb[2].mxu0 %vm489_vm5, %v406_v25 }
 0x1dd   : > { %v646_v27 = vpop.f32.mrb[2].mxu1 }
 0x1de   : > { %v650_v28 = vadd.f32 %v646_v27, %v579_v26  ;;  %v927_v29 = vpop.f32.mrb[3].mxu1 }
 0x1e0   : > { %652 = vst.msk [vmem:[%s1163_s10] sm:$0xf] %vm651_vm7, %v650_v28 }
 0x1e1   : > { %v720_v31 = vpop.f32.mrb[4].mxu1 }
 0x1e2   : > { %v724_v32 = vadd.f32 %v720_v31, %v653_v30  ;;  %v932_v33 = vpop.f32.mrb[5].mxu1 }
 0x1e4   : > { %725 = vst.msk [vmem:[%s1168_s13] sm:$0xf] %vm651_vm7, %v724_v32  ;;  %v922_v36 = vpop.f32.mrb[2].mxu0 }
 0x1e5   : > { %v574_v37 = vadd.f32 %v922_v36, %v497_v34  ;;  %v564_v38 = vpop.f32.mrb[3].mxu0 }
 0x1e6   : > { %v573_v39 = vadd.f32 %v564_v38, %v496_v35 }
 0x1e7   : > { %578 = vst.msk [vmem:[%s1158_s7 + $0x8] sm:$0x1f] %vm577_vm8, %v574_v37 }
 0x1e8   : > { %576 = vst.msk [vmem:[%s1158_s7] sm:$0xff] %vm575_vm9, %v573_v39 }
 0x1e9 PF: > { %s16_s24 = sadd.s32 1, %s1054_s24   ;;  %s1233_s18 = smov %s1034_s19 }
 0x1ea   : > { %p13_p12 = scmp.ge.s32.totalorder %s16_s24, 10   ;;  %s1234_s19 = smov %s1141_s6 }
 0x1eb   : > { %s1235_s20 = smov %s1046_s22  ;;  %s1236_s21 = smov %s1050_s23 }
 0x1ec   : > { %s1237_s22 = smov %s1240_s25  ;;  %s1238_s23 = smov %s1244_s26 }
 0x1ed   :  { %15 = sbr.rel (!%p13_p12) target bundleno = 4 (0x4), region = 133 }

</bundles_post_ra>
